<compile_context>
chip_gen: v6e
topology: v6e:2x2x1
jax: 0.10.0
libtpu: 0.0.40
codegen_flags: <defaults>
</compile_context>

<pallas_src>
import jax
import jax.numpy as jnp
from jax.experimental import pallas as pl
from jax.experimental.pallas import tpu as pltpu


def _softmax_sublane_kernel(x_ref, o_ref):
    """Numerically-stable softmax along axis 0 (sublane axis) of an (S, N) block."""
    x = x_ref[...].astype(jnp.float32)           # (S, N), lane-dense
    m = jnp.max(x, axis=0, keepdims=True)        # (1, N)
    e = jnp.exp(x - m)
    d = jnp.sum(e, axis=0, keepdims=True)        # (1, N)
    # Exact divide (not pl.reciprocal(approx=True)) to keep row sums within 1e-5.
    o_ref[...] = (e / d).astype(o_ref.dtype)


def softmax_over_axis0(x):
    """x: (S, N) -> softmax over axis 0.  Single block, no grid: the whole
    array lives in VMEM for the duration of the kernel."""
    S, N = x.shape
    return pl.pallas_call(
        _softmax_sublane_kernel,
        out_shape=jax.ShapeDtypeStruct((S, N), x.dtype),
        in_specs=[pl.BlockSpec(memory_space=pltpu.MemorySpace.VMEM)],
        out_specs=pl.BlockSpec(memory_space=pltpu.MemorySpace.VMEM),
    )(x)


class MockOutput:
    def __init__(self, last_hidden_state, attentions):
        self.last_hidden_state = last_hidden_state
        self.attentions = attentions


def mock_model_forward(key, output_attentions=True):
    """JAX/Pallas equivalent of MockModel.forward().

    - hidden_states: random normal (batch=1, seq=10, hidden=256) — pure glue,
      the PyTorch module does no compute on it.
    - attentions: for each of 3 layers, softmax(randn(batch, heads=8, seq, seq))
      along the last dim; the softmax runs in the Pallas kernel.
    """
    batch_size, seq_len, hidden_size = 1, 10, 256
    num_heads, num_layers = 8, 3

    k_hidden, k_attn = jax.random.split(key)
    hidden_states = jax.random.normal(
        k_hidden, (batch_size, seq_len, hidden_size), dtype=jnp.float32)

    if not output_attentions:
        return MockOutput(hidden_states, None)

    # Logits generated directly in the kernel's lane-dense layout:
    # (S, L*B*H*S) = (10, 240); softmax axis on sublanes, rows on lanes.
    n_rows = num_layers * batch_size * num_heads * seq_len
    logits_t = jax.random.normal(
        k_attn, (seq_len, n_rows), dtype=jnp.float32)

    probs_t = softmax_over_axis0(logits_t)                     # (S, N)

    # Back to PyTorch convention: [flat(l,b,h,i), j] -> (L, B, H, S, S).
    probs = probs_t.T.reshape(
        num_layers, batch_size, num_heads, seq_len, seq_len)

    # Per-layer tuple to match MockOutput.attentions semantics (cheap slices).
    attentions = tuple(probs[l] for l in range(num_layers))
    return MockOutput(hidden_states, attentions)


if __name__ == "__main__":
    key = jax.random.PRNGKey(0)
    out = mock_model_forward(key, output_attentions=True)

    jax.block_until_ready(out.last_hidden_state)
    for a in out.attentions:
        jax.block_until_ready(a)

    # Sanity checks mirroring the PyTorch semantics.
    assert out.last_hidden_state.shape == (1, 10, 256)
    assert len(out.attentions) == 3
    for a in out.attentions:
        assert a.shape == (1, 8, 10, 10)
        row_sums = jnp.sum(a, axis=-1)
        assert bool(jnp.allclose(row_sums, 1.0, atol=1e-5))
        assert bool(jnp.all(a >= 0.0))

    print("KERNEL_OK")
</pallas_src>

<mosaic_0001>
module attributes {stable_mosaic.version = 11 : i64} {
  func.func @_softmax_sublane_kernel(%arg0: memref<10x240xf32, #tpu.memory_space<vmem>>, %arg1: memref<10x240xf32, #tpu.memory_space<vmem>>) attributes {dimension_semantics = [], scalar_prefetch = 0 : i64, scratch_operands = 0 : i64, tpu.core_type = #tpu.core_type<tc>} {
    %c0 = arith.constant 0 : index
    %c0_0 = arith.constant 0 : index
    %0 = vector.load %arg0[%c0, %c0_0] : memref<10x240xf32, #tpu.memory_space<vmem>>, vector<10x240xf32>
    %cst = arith.constant dense<0xFF800000> : vector<240xf32>
    %1 = vector.multi_reduction <maximumf>, %0, %cst [0] : vector<10x240xf32> to vector<240xf32>
    %2 = vector.shape_cast %1 : vector<240xf32> to vector<1x240xf32>
    %3 = vector.broadcast %2 : vector<1x240xf32> to vector<10x240xf32>
    %4 = arith.subf %0, %3 : vector<10x240xf32>
    %5 = math.exp %4 : vector<10x240xf32>
    %cst_1 = arith.constant dense<0.000000e+00> : vector<240xf32>
    %6 = vector.multi_reduction <add>, %5, %cst_1 [0] : vector<10x240xf32> to vector<240xf32>
    %7 = vector.shape_cast %6 : vector<240xf32> to vector<1x240xf32>
    %8 = vector.broadcast %7 : vector<1x240xf32> to vector<10x240xf32>
    %9 = arith.divf %5, %8 : vector<10x240xf32>
    %c0_2 = arith.constant 0 : index
    %c0_3 = arith.constant 0 : index
    %10 = vector.load %arg1[%c0_2, %c0_3] : memref<10x240xf32, #tpu.memory_space<vmem>>, vector<10x240xf32>
    tpu.vector_store %arg1[%c0_2, %c0_3], %9 {strides = array<i32>} : memref<10x240xf32, #tpu.memory_space<vmem>>, vector<10x240xf32>,
    return
  }
}

</mosaic_0001>

<bundles_post_ra>
// kernel: tpu_custom_call.1
= control target key start
LH: loop header
LB: loop body
LE: loop exit
PB: predicated region body
PF: predicated region fallthrough
CT: control target
= control target key end

     0   :  { %6 = vsyncpa [#allocation3], 0  ;;  %s197_s0 = inlined_call_operand.hbm [shape: f32[10,240], index: 0, kind: input, shape index: {}]   ;;  %s198_s1 = inlined_call_operand.hbm [shape: f32[10,240], index: 1, kind: output, shape index: {}]  }
   0x1   :  { %7 = vsyncpa [#allocation4], 0  ;;  %s163_s6 = smov [#allocation2]  }
   0x2   :  { %s13_s7 = sshll.u32 %s163_s6, 4  ;;  %s14_s7 = int_to_ptr.vmem [resolvable:$true] %s13_s7 }
   0x3   :  { %s127_s8 = scalar_lea.vmem %s14_s7, 512  ;;  %p132_p1 = scmp.lt.s32.totalorder %s14_s7, %s14_s7 }
   0x4   :  { %p128_p0 = scmp.ne.s32.totalorder %s14_s7, %s127_s8  ;;  %p133_p2 = scmp.lt.s32.totalorder %s127_s8, %s127_s8 }
   0x6   :  { %p134_p3 = por %p133_p2, %p132_p1 }
   0x8   :  { %p135_p4 = pnand %p134_p3, %p128_p0 }
   0xa   :  { %138 = shalt.err (!%p135_p4)
}
   0xb   :  { %s164_s9 = smov 256   ;;  %s165_s10 = smov 16  }
   0xc   :  { %19 = dma.hbm_to_vmem [thread:$0]  %s197_s0, 512, %s14_s7, [#allocation3], %s164_s9, %s164_s9, %s165_s10  }
   0xd   :  { %159 = dma.done.wait [#allocation3], 512  }
   0xe   :  { %160 = vsyncadd [#allocation3], 4294966784  ;;  %vm27_vm0 = vcmask 1041408   ;;  %vm36_vm1 = vcmask 916480   ;;  %vm38_vm2 = vcmask 910336   ;;  %v23_v0 = vld [vmem:[#allocation2] sm:$0xff] }
   0xf   :  { %v25_v1 = vld [vmem:[#allocation2 + $0x10] sm:$0x3]  ;;  %v24_v2 = vld [vmem:[#allocation2 + $0x8] sm:$0xff]  ;;  %v26_v4 = vld [vmem:[#allocation2 + $0x18] sm:$0x3]  ;;  %s166_s0 = smov [#allocation5]  }
  0x10   :  { %v28_v3 = vsel %vm27_vm0, %v25_v1, -inf  ;;  %v37_v5 = vsel %vm36_vm1, %v24_v2, -inf  ;;  %v39_v7 = vsel %vm38_vm2, %v26_v4, -inf  ;;  %s91_s13 = sshll.u32 %s166_s0, 4  ;;  %s92_s13 = int_to_ptr.vmem [resolvable:$true] %s91_s13 }
  0x11   :  { %v29_v6 = vmax.f32 %v23_v0, %v28_v3  ;;  %v40_v8 = vmax.f32 %v37_v5, %v39_v7  ;;  %s139_s14 = scalar_lea.vmem %s92_s13, 512  ;;  %p144_p6 = scmp.lt.s32.totalorder %s92_s13, %s92_s13 }
  0x12   :  { %p140_p5 = scmp.ne.s32.totalorder %s92_s13, %s139_s14  ;;  %p145_p7 = scmp.lt.s32.totalorder %s139_s14, %s139_s14 }
  0x13   :  { %v30_v9 = vrot.slane %v29_v6, 4  ;;  %v41_v10 = vrot.slane %v40_v8, 4 }
  0x14   :  { %p146_p8 = por %p145_p7, %p144_p6 }
  0x15   :  { %v31_v11 = vmax.f32 %v29_v6, %v30_v9  ;;  %v42_v12 = vmax.f32 %v40_v8, %v41_v10 }
  0x16   :  { %p147_p9 = pnand %p146_p8, %p140_p5 }
  0x17   :  { %v32_v13 = vrot.slane %v31_v11, 2  ;;  %v43_v14 = vrot.slane %v42_v12, 2 }
  0x19   :  { %v33_v15 = vmax.f32 %v31_v11, %v32_v13  ;;  %v44_v16 = vmax.f32 %v42_v12, %v43_v14 }
  0x1b   :  { %v34_v17 = vrot.slane %v33_v15, 1  ;;  %v45_v18 = vrot.slane %v44_v16, 1 }
  0x1d   :  { %v35_v19 = vmax.f32 %v33_v15, %v34_v17  ;;  %v46_v20 = vmax.f32 %v44_v16, %v45_v18 }
  0x1f   :  { %v47_v21 = vsub.f32 %v23_v0, %v35_v19  ;;  %v49_v22 = vsub.f32 %v25_v1, %v35_v19  ;;  %v48_v23 = vsub.f32 %v24_v2, %v46_v20  ;;  %v50_v24 = vsub.f32 %v26_v4, %v46_v20 }
  0x21   :  { %v51_v25 = vmul.f32 1.442695, %v47_v21  ;;  %v55_v26 = vmul.f32 1.442695, %v49_v22  ;;  %v53_v27 = vmul.f32 1.442695, %v48_v23 }
  0x22   :  { %v57_v28 = vmul.f32 1.442695, %v50_v24 }
  0x23   :  { %107 = vpow2.f32 %v51_v25 }
  0x24   :  { %109 = vpow2.f32 %v55_v26 }
  0x25   :  { %111 = vpow2.f32 %v53_v27 }
  0x26   :  { %113 = vpow2.f32 %v57_v28 }
  0x30   :  { %v108_v29 = vpop.eup %107 }
  0x31   :  { %v110_v30 = vpop.eup %109 }
  0x32   :  { %v112_v31 = vpop.eup %111  ;;  %v59_v32 = vsel %vm27_vm0, %v110_v30, 0.0 }
  0x33   :  { %v114_v33 = vpop.eup %113  ;;  %v60_v34 = vadd.f32 %v108_v29, %v59_v32  ;;  %v67_v35 = vsel %vm36_vm1, %v112_v31, 0.0 }
  0x34   :  { %v68_v36 = vsel %vm38_vm2, %v114_v33, 0.0 }
  0x35   :  { %v61_v37 = vrot.slane %v60_v34, 4  ;;  %v69_v38 = vadd.f32 %v68_v36, %v67_v35 }
  0x37   :  { %v62_v39 = vadd.f32 %v61_v37, %v60_v34  ;;  %v70_v40 = vrot.slane %v69_v38, 4 }
  0x39   :  { %v63_v41 = vrot.slane %v62_v39, 2  ;;  %v71_v42 = vadd.f32 %v70_v40, %v69_v38 }
  0x3b   :  { %v64_v43 = vadd.f32 %v63_v41, %v62_v39  ;;  %v72_v44 = vrot.slane %v71_v42, 2 }
  0x3d   :  { %v65_v45 = vrot.slane %v64_v43, 1  ;;  %v73_v46 = vadd.f32 %v72_v44, %v71_v42 }
  0x3f   :  { %v66_v47 = vadd.f32 %v65_v45, %v64_v43  ;;  %v74_v48 = vrot.slane %v73_v46, 1 }
  0x41   :  { %115 = vrcp.f32 %v66_v47  ;;  %v75_v49 = vadd.f32 %v74_v48, %v73_v46 }
  0x43   :  { %117 = vrcp.f32 %v75_v49 }
  0x4e   :  { %v116_v50 = vpop.eup %115 }
  0x4f   :  { %v77_v51 = vmul.f32 %v116_v50, %v108_v29  ;;  %v80_v52 = vmul.f32 %v116_v50, %v110_v30 }
  0x50   :  { %v118_v53 = vpop.eup %117 }
  0x51   :  { %82 = vst [vmem:[#allocation5] sm:$0xff] %v77_v51  ;;  %v79_v54 = vmul.f32 %v118_v53, %v112_v31  ;;  %84 = vst [vmem:[#allocation5 + $0x10] sm:$0x3] %v80_v52  ;;  %v81_v55 = vmul.f32 %v118_v53, %v114_v33 }
  0x53   :  { %83 = vst.msk [vmem:[#allocation5 + $0x8] sm:$0xff] %vm36_vm1, %v79_v54 }
  0x54   :  { %85 = vst.msk [vmem:[#allocation5 + $0x18] sm:$0x3] %vm38_vm2, %v81_v55 }
  0x55   :  { %150 = shalt.err (!%p147_p9)
}
  0x56   :  { %97 = dma.vmem_to_hbm [thread:$0]  %s92_s13, 512, %s198_s1, [#allocation4], %s164_s9, %s164_s9, %s165_s10  }
  0x57   :  { %161 = dma.done.wait [#allocation4], 512  }
  0x58   :  { %162 = vsyncadd [#allocation4], 4294966784 }
  0x59   :  { %101 = vsyncpa [#allocation3], 1 }
  0x5a   :  { %102 = vsyncpa [#allocation4], 1 }

</bundles_post_ra>
